<compile_context>
chip_gen: v7x
topology: tpu7x:2x2x1
jax: 0.10.0
libtpu: 0.0.40
codegen_flags: <defaults>
</compile_context>

<pallas_src>
import functools

import jax
import jax.numpy as jnp
import numpy as np
from jax.experimental import pallas as pl
from jax.experimental.pallas import tpu as pltpu

# torch.finfo(torch.float32).eps (PyTorch default dtype)
EPS = float(np.finfo(np.float32).eps)

_LANE = 128      # vreg lane width
_MAX_TB = 64     # batch-tile rows (bounds vreg pressure of the (tb,128) partials)
_MAX_TT = 8192   # time-tile cols; f32 block at tb=64 -> 2 MiB (fine on all gens)


def _round_up(x: int, m: int) -> int:
    return ((x + m - 1) // m) * m


def _vmem_capacity_bytes() -> int:
    try:
        return int(pltpu.get_tpu_info().vmem_capacity_bytes)
    except Exception:
        return 64 * 2**20   # conservative (v7x per-TC) fallback


def _sisnr_kernel(ref_ref, inf_ref, out_ref,
                  sr_ref, si_ref, srr_ref, sii_ref, sri_ref,
                  *, eps: float, t_true: int):
    k = pl.program_id(1)
    tb, tt = ref_ref.shape
    n_chunks = tt // _LANE
    # Valid columns in the *last* time block (static).  Chunks whose lane range
    # exceeds this need masking; for earlier k those chunks are automatically
    # all-valid because the global column index stays < t_true.
    rem = t_true - ((t_true - 1) // tt) * tt
    need_mask = rem < tt

    @pl.when(k == 0)
    def _init():
        for s in (sr_ref, si_ref, srr_ref, sii_ref, sri_ref):
            s[...] = jnp.zeros_like(s)

    if need_mask:
        lanes = jax.lax.broadcasted_iota(jnp.int32, (tb, _LANE), 1)
        col0 = k * tt   # global column index of this block's first column

    # Lane-dense partial moments for this (tb, tt) tile: pure VPU adds over
    # 128-lane chunks; no cross-lane (XLU) reductions in the streaming phase.
    psr = jnp.zeros((tb, _LANE), jnp.float32)
    psi = jnp.zeros_like(psr)
    psrr = jnp.zeros_like(psr)
    psii = jnp.zeros_like(psr)
    psri = jnp.zeros_like(psr)

    for c in range(n_chunks):
        lo = c * _LANE
        rc = ref_ref[:, lo:lo + _LANE].astype(jnp.float32)
        xc = inf_ref[:, lo:lo + _LANE].astype(jnp.float32)
        if need_mask and (c + 1) * _LANE > rem:
            valid = (col0 + lo + lanes) < t_true
            rc = jnp.where(valid, rc, 0.0)
            xc = jnp.where(valid, xc, 0.0)
        psr = psr + rc
        psi = psi + xc
        psrr = psrr + rc * rc
        psii = psii + xc * xc
        psri = psri + rc * xc

    sr_ref[...] += psr
    si_ref[...] += psi
    srr_ref[...] += psrr
    sii_ref[...] += psii
    sri_ref[...] += psri

    @pl.when(k == pl.num_programs(1) - 1)
    def _finalize():
        inv_t = jnp.float32(1.0 / t_true)
        # One cross-lane reduce per quantity, only here.
        sr = jnp.sum(sr_ref[...], axis=-1, keepdims=True)
        si = jnp.sum(si_ref[...], axis=-1, keepdims=True)
        srr = jnp.sum(srr_ref[...], axis=-1, keepdims=True)
        sii = jnp.sum(sii_ref[...], axis=-1, keepdims=True)
        sri = jnp.sum(sri_ref[...], axis=-1, keepdims=True)
        # Centered moments == sums over the zero-mean signals of the reference:
        dot_c = sri - sr * si * inv_t        # <s_estimate, s_target>
        e_t = srr - sr * sr * inv_t          # ||s_target||^2
        e_e = sii - si * si * inv_t          # ||s_estimate||^2
        alpha = dot_c / (e_t + eps)          # eps placed exactly as in reference
        num = alpha * alpha * e_t            # ||pair_wise_proj||^2
        den = e_e - 2.0 * alpha * dot_c + num + eps   # ||e_noise||^2 + eps
        si_snr = 10.0 * jnp.log10(num / den + eps)
        out_ref[...] = (-si_snr).astype(out_ref.dtype)


def si_snr_loss(ref: jax.Array, inf: jax.Array, eps: float = EPS) -> jax.Array:
    """Negative SI-SNR per batch row.  ref, inf: (B, T).  Returns (B,) float32.

    Any float input dtype is accepted (bf16 recommended for bandwidth); the
    moments are accumulated in float32 and the loss is returned in float32.
    """
    assert ref.shape == inf.shape, f"ref {ref.shape}; inf {inf.shape}"
    B, T = ref.shape

    # Time tile: always a multiple of 128 (lane width) so lane-dense
    # accumulation works; the ragged tail is masked in-kernel.
    tt = min(_round_up(T, _LANE), _MAX_TT)
    kt = -(-T // tt)

    # Batch tile: full-dim for tiny B; otherwise a multiple of 8 chosen so
    # there are >= 2 batch blocks (lets the "parallel" axis use both v7x TCs).
    if B <= 8:
        tb = B
    else:
        tb = min(_MAX_TB, _round_up(-(-B // 2), 8))
    nb = -(-B // tb)

    in_bytes = tb * tt * (jnp.dtype(ref.dtype).itemsize + jnp.dtype(inf.dtype).itemsize)
    vmem_cap = _vmem_capacity_bytes()
    # 2 pipeline buffers per input + scratch/output + headroom; per-gen safe cap.
    vmem_limit = 2 * in_bytes + 5 * tb * _LANE * 4 + (8 << 20)
    vmem_limit = int(max(16 << 20, min(vmem_limit, 48 << 20, vmem_cap - (8 << 20))))

    out = pl.pallas_call(
        functools.partial(_sisnr_kernel, eps=float(eps), t_true=T),
        out_shape=jax.ShapeDtypeStruct((B, 1), jnp.float32),
        grid_spec=pltpu.PrefetchScalarGridSpec(
            num_scalar_prefetch=0,
            grid=(nb, kt),
            in_specs=[
                pl.BlockSpec((tb, tt), lambda i, k: (i, k)),
                pl.BlockSpec((tb, tt), lambda i, k: (i, k)),
            ],
            # Output block is resident across the (arbitrary) time axis and is
            # written once, in the finalize phase.
            out_specs=pl.BlockSpec((tb, 1), lambda i, k: (i, 0)),
            scratch_shapes=[pltpu.VMEM((tb, _LANE), jnp.float32)] * 5,
        ),
        compiler_params=pltpu.CompilerParams(
            dimension_semantics=("parallel", "arbitrary"),
            vmem_limit_bytes=vmem_limit,
        ),
    )(ref, inf)
    return out[:, 0]


def _si_snr_loss_ref(ref, inf, eps=EPS):
    # Pure-JAX reference (mirrors the PyTorch module) for correctness checking.
    ref = ref.astype(jnp.float32)
    inf = inf.astype(jnp.float32)
    T = ref.shape[-1]
    st = ref - jnp.sum(ref, axis=1, keepdims=True) / T
    se = inf - jnp.sum(inf, axis=1, keepdims=True) / T
    dot = jnp.sum(se * st, axis=1, keepdims=True)
    energy = jnp.sum(st ** 2, axis=1, keepdims=True) + eps
    proj = dot * st / energy
    noise = se - proj
    ratio = jnp.sum(proj ** 2, axis=1) / (jnp.sum(noise ** 2, axis=1) + eps)
    return -10.0 * jnp.log10(ratio + eps)


if __name__ == "__main__":
    key = jax.random.PRNGKey(0)
    k1, k2, k3, k4, k5, k6 = jax.random.split(key, 6)

    # 1) Small case consistent with the module's forward (single tile, no mask).
    B, T = 2, 256
    ref = jax.random.normal(k1, (B, T), dtype=jnp.float32)
    inf = ref + 0.3 * jax.random.normal(k2, (B, T), dtype=jnp.float32)
    out = si_snr_loss(ref, inf)
    jax.block_until_ready(out)
    np.testing.assert_allclose(
        np.asarray(out), np.asarray(_si_snr_loss_ref(ref, inf)), rtol=1e-3, atol=1e-3
    )

    # 2) Ragged T (in-kernel lane masking of the last 128-chunk), single time tile.
    B2, T2 = 3, 5000
    ref2 = jax.random.normal(k3, (B2, T2), dtype=jnp.float32)
    inf2 = ref2 + 0.5 * jax.random.normal(k4, (B2, T2), dtype=jnp.float32)
    out2 = si_snr_loss(ref2, inf2)
    jax.block_until_ready(out2)
    np.testing.assert_allclose(
        np.asarray(out2), np.asarray(_si_snr_loss_ref(ref2, inf2)), rtol=1e-3, atol=1e-3
    )

    # 3) Streamed time axis (multiple time tiles) + ragged last time tile +
    #    split batch grid with a ragged last batch block.
    B3, T3 = 20, 20000
    ref3 = jax.random.normal(k5, (B3, T3), dtype=jnp.float32)
    inf3 = ref3 + 0.5 * jax.random.normal(k6, (B3, T3), dtype=jnp.float32)
    out3 = si_snr_loss(ref3, inf3)
    jax.block_until_ready(out3)
    np.testing.assert_allclose(
        np.asarray(out3), np.asarray(_si_snr_loss_ref(ref3, inf3)), rtol=1e-3, atol=1e-3
    )

    print("KERNEL_OK")
</pallas_src>

<mosaic_0001>
module attributes {stable_mosaic.version = 11 : i64} {
  func.func @_sisnr_kernel(%arg0: i32, %arg1: i32, %arg2: memref<2x256xf32, #tpu.memory_space<vmem>>, %arg3: memref<2x256xf32, #tpu.memory_space<vmem>>, %arg4: memref<2x1xf32, #tpu.memory_space<vmem>>, %arg5: memref<2x128xf32, #tpu.memory_space<vmem>>, %arg6: memref<2x128xf32, #tpu.memory_space<vmem>>, %arg7: memref<2x128xf32, #tpu.memory_space<vmem>>, %arg8: memref<2x128xf32, #tpu.memory_space<vmem>>, %arg9: memref<2x128xf32, #tpu.memory_space<vmem>>) attributes {dimension_semantics = [#tpu.dimension_semantics<parallel>, #tpu.dimension_semantics<arbitrary>], iteration_bounds = array<i64: 1, 1>, scalar_prefetch = 0 : i64, scratch_operands = 5 : i64, tpu.core_type = #tpu.core_type<tc>, window_params = [{transform_indices = @transform_0, window_bounds = array<i64: 2, 256>}, {transform_indices = @transform_1, window_bounds = array<i64: 2, 256>}, {transform_indices = @transform_2, window_bounds = array<i64: 2, 1>}]} {
    %c0_i32 = arith.constant 0 : i32
    %0 = arith.cmpi eq, %arg1, %c0_i32 : i32
    %1 = arith.extui %0 : i1 to i32
    %c0_i32_0 = arith.constant 0 : i32
    %2 = arith.cmpi ne, %1, %c0_i32_0 : i32
    scf.if %2 {
      %cst_33 = arith.constant 0.000000e+00 : f32
      %46 = vector.broadcast %cst_33 : f32 to vector<2x128xf32>
      %c0_34 = arith.constant 0 : index
      %c0_35 = arith.constant 0 : index
      %47 = vector.load %arg5[%c0_34, %c0_35] : memref<2x128xf32, #tpu.memory_space<vmem>>, vector<2x128xf32>
      tpu.vector_store %arg5[%c0_34, %c0_35], %46 {strides = array<i32>} : memref<2x128xf32, #tpu.memory_space<vmem>>, vector<2x128xf32>,
      %cst_36 = arith.constant 0.000000e+00 : f32
      %48 = vector.broadcast %cst_36 : f32 to vector<2x128xf32>
      %c0_37 = arith.constant 0 : index
      %c0_38 = arith.constant 0 : index
      %49 = vector.load %arg6[%c0_37, %c0_38] : memref<2x128xf32, #tpu.memory_space<vmem>>, vector<2x128xf32>
      tpu.vector_store %arg6[%c0_37, %c0_38], %48 {strides = array<i32>} : memref<2x128xf32, #tpu.memory_space<vmem>>, vector<2x128xf32>,
      %cst_39 = arith.constant 0.000000e+00 : f32
      %50 = vector.broadcast %cst_39 : f32 to vector<2x128xf32>
      %c0_40 = arith.constant 0 : index
      %c0_41 = arith.constant 0 : index
      %51 = vector.load %arg7[%c0_40, %c0_41] : memref<2x128xf32, #tpu.memory_space<vmem>>, vector<2x128xf32>
      tpu.vector_store %arg7[%c0_40, %c0_41], %50 {strides = array<i32>} : memref<2x128xf32, #tpu.memory_space<vmem>>, vector<2x128xf32>,
      %cst_42 = arith.constant 0.000000e+00 : f32
      %52 = vector.broadcast %cst_42 : f32 to vector<2x128xf32>
      %c0_43 = arith.constant 0 : index
      %c0_44 = arith.constant 0 : index
      %53 = vector.load %arg8[%c0_43, %c0_44] : memref<2x128xf32, #tpu.memory_space<vmem>>, vector<2x128xf32>
      tpu.vector_store %arg8[%c0_43, %c0_44], %52 {strides = array<i32>} : memref<2x128xf32, #tpu.memory_space<vmem>>, vector<2x128xf32>,
      %cst_45 = arith.constant 0.000000e+00 : f32
      %54 = vector.broadcast %cst_45 : f32 to vector<2x128xf32>
      %c0_46 = arith.constant 0 : index
      %c0_47 = arith.constant 0 : index
      %55 = vector.load %arg9[%c0_46, %c0_47] : memref<2x128xf32, #tpu.memory_space<vmem>>, vector<2x128xf32>
      tpu.vector_store %arg9[%c0_46, %c0_47], %54 {strides = array<i32>} : memref<2x128xf32, #tpu.memory_space<vmem>>, vector<2x128xf32>,
    } else {
    }
    %cst = arith.constant 0.000000e+00 : f32
    %3 = vector.broadcast %cst : f32 to vector<2x128xf32>
    %cst_1 = arith.constant 0.000000e+00 : f32
    %4 = vector.broadcast %cst_1 : f32 to vector<2x128xf32>
    %cst_2 = arith.constant 0.000000e+00 : f32
    %5 = vector.broadcast %cst_2 : f32 to vector<2x128xf32>
    %cst_3 = arith.constant 0.000000e+00 : f32
    %6 = vector.broadcast %cst_3 : f32 to vector<2x128xf32>
    %cst_4 = arith.constant 0.000000e+00 : f32
    %7 = vector.broadcast %cst_4 : f32 to vector<2x128xf32>
    %c0 = arith.constant 0 : index
    %c0_5 = arith.constant 0 : index
    %8 = vector.load %arg2[%c0, %c0_5] : memref<2x256xf32, #tpu.memory_space<vmem>>, vector<2x128xf32>
    %c0_6 = arith.constant 0 : index
    %c0_7 = arith.constant 0 : index
    %9 = vector.load %arg3[%c0_6, %c0_7] : memref<2x256xf32, #tpu.memory_space<vmem>>, vector<2x128xf32>
    %10 = arith.addf %3, %8 : vector<2x128xf32>
    %11 = arith.addf %4, %9 : vector<2x128xf32>
    %12 = arith.mulf %8, %8 : vector<2x128xf32>
    %13 = arith.addf %5, %12 : vector<2x128xf32>
    %14 = arith.mulf %9, %9 : vector<2x128xf32>
    %15 = arith.addf %6, %14 : vector<2x128xf32>
    %16 = arith.mulf %8, %9 : vector<2x128xf32>
    %17 = arith.addf %7, %16 : vector<2x128xf32>
    %c0_8 = arith.constant 0 : index
    %c128 = arith.constant 128 : index
    %18 = vector.load %arg2[%c0_8, %c128] : memref<2x256xf32, #tpu.memory_space<vmem>>, vector<2x128xf32>
    %c0_9 = arith.constant 0 : index
    %c128_10 = arith.constant 128 : index
    %19 = vector.load %arg3[%c0_9, %c128_10] : memref<2x256xf32, #tpu.memory_space<vmem>>, vector<2x128xf32>
    %20 = arith.addf %10, %18 : vector<2x128xf32>
    %21 = arith.addf %11, %19 : vector<2x128xf32>
    %22 = arith.mulf %18, %18 : vector<2x128xf32>
    %23 = arith.addf %13, %22 : vector<2x128xf32>
    %24 = arith.mulf %19, %19 : vector<2x128xf32>
    %25 = arith.addf %15, %24 : vector<2x128xf32>
    %26 = arith.mulf %18, %19 : vector<2x128xf32>
    %27 = arith.addf %17, %26 : vector<2x128xf32>
    %c0_11 = arith.constant 0 : index
    %c0_12 = arith.constant 0 : index
    %28 = vector.load %arg5[%c0_11, %c0_12] : memref<2x128xf32, #tpu.memory_space<vmem>>, vector<2x128xf32>
    %29 = arith.addf %28, %20 : vector<2x128xf32>
    %c0_13 = arith.constant 0 : index
    %c0_14 = arith.constant 0 : index
    %30 = vector.load %arg5[%c0_13, %c0_14] : memref<2x128xf32, #tpu.memory_space<vmem>>, vector<2x128xf32>
    tpu.vector_store %arg5[%c0_13, %c0_14], %29 {strides = array<i32>} : memref<2x128xf32, #tpu.memory_space<vmem>>, vector<2x128xf32>,
    %c0_15 = arith.constant 0 : index
    %c0_16 = arith.constant 0 : index
    %31 = vector.load %arg6[%c0_15, %c0_16] : memref<2x128xf32, #tpu.memory_space<vmem>>, vector<2x128xf32>
    %32 = arith.addf %31, %21 : vector<2x128xf32>
    %c0_17 = arith.constant 0 : index
    %c0_18 = arith.constant 0 : index
    %33 = vector.load %arg6[%c0_17, %c0_18] : memref<2x128xf32, #tpu.memory_space<vmem>>, vector<2x128xf32>
    tpu.vector_store %arg6[%c0_17, %c0_18], %32 {strides = array<i32>} : memref<2x128xf32, #tpu.memory_space<vmem>>, vector<2x128xf32>,
    %c0_19 = arith.constant 0 : index
    %c0_20 = arith.constant 0 : index
    %34 = vector.load %arg7[%c0_19, %c0_20] : memref<2x128xf32, #tpu.memory_space<vmem>>, vector<2x128xf32>
    %35 = arith.addf %34, %23 : vector<2x128xf32>
    %c0_21 = arith.constant 0 : index
    %c0_22 = arith.constant 0 : index
    %36 = vector.load %arg7[%c0_21, %c0_22] : memref<2x128xf32, #tpu.memory_space<vmem>>, vector<2x128xf32>
    tpu.vector_store %arg7[%c0_21, %c0_22], %35 {strides = array<i32>} : memref<2x128xf32, #tpu.memory_space<vmem>>, vector<2x128xf32>,
    %c0_23 = arith.constant 0 : index
    %c0_24 = arith.constant 0 : index
    %37 = vector.load %arg8[%c0_23, %c0_24] : memref<2x128xf32, #tpu.memory_space<vmem>>, vector<2x128xf32>
    %38 = arith.addf %37, %25 : vector<2x128xf32>
    %c0_25 = arith.constant 0 : index
    %c0_26 = arith.constant 0 : index
    %39 = vector.load %arg8[%c0_25, %c0_26] : memref<2x128xf32, #tpu.memory_space<vmem>>, vector<2x128xf32>
    tpu.vector_store %arg8[%c0_25, %c0_26], %38 {strides = array<i32>} : memref<2x128xf32, #tpu.memory_space<vmem>>, vector<2x128xf32>,
    %c0_27 = arith.constant 0 : index
    %c0_28 = arith.constant 0 : index
    %40 = vector.load %arg9[%c0_27, %c0_28] : memref<2x128xf32, #tpu.memory_space<vmem>>, vector<2x128xf32>
    %41 = arith.addf %40, %27 : vector<2x128xf32>
    %c0_29 = arith.constant 0 : index
    %c0_30 = arith.constant 0 : index
    %42 = vector.load %arg9[%c0_29, %c0_30] : memref<2x128xf32, #tpu.memory_space<vmem>>, vector<2x128xf32>
    tpu.vector_store %arg9[%c0_29, %c0_30], %41 {strides = array<i32>} : memref<2x128xf32, #tpu.memory_space<vmem>>, vector<2x128xf32>,
    %c0_i32_31 = arith.constant 0 : i32
    %43 = arith.cmpi eq, %arg1, %c0_i32_31 : i32
    %44 = arith.extui %43 : i1 to i32
    %c0_i32_32 = arith.constant 0 : i32
    %45 = arith.cmpi ne, %44, %c0_i32_32 : i32
    scf.if %45 {
      %c0_33 = arith.constant 0 : index
      %c0_34 = arith.constant 0 : index
      %46 = vector.load %arg5[%c0_33, %c0_34] : memref<2x128xf32, #tpu.memory_space<vmem>>, vector<2x128xf32>
      %cst_35 = arith.constant dense<0.000000e+00> : vector<2xf32>
      %47 = vector.multi_reduction <add>, %46, %cst_35 [1] : vector<2x128xf32> to vector<2xf32>
      %48 = vector.shape_cast %47 : vector<2xf32> to vector<2x1xf32>
      %c0_36 = arith.constant 0 : index
      %c0_37 = arith.constant 0 : index
      %49 = vector.load %arg6[%c0_36, %c0_37] : memref<2x128xf32, #tpu.memory_space<vmem>>, vector<2x128xf32>
      %cst_38 = arith.constant dense<0.000000e+00> : vector<2xf32>
      %50 = vector.multi_reduction <add>, %49, %cst_38 [1] : vector<2x128xf32> to vector<2xf32>
      %51 = vector.shape_cast %50 : vector<2xf32> to vector<2x1xf32>
      %c0_39 = arith.constant 0 : index
      %c0_40 = arith.constant 0 : index
      %52 = vector.load %arg7[%c0_39, %c0_40] : memref<2x128xf32, #tpu.memory_space<vmem>>, vector<2x128xf32>
      %cst_41 = arith.constant dense<0.000000e+00> : vector<2xf32>
      %53 = vector.multi_reduction <add>, %52, %cst_41 [1] : vector<2x128xf32> to vector<2xf32>
      %54 = vector.shape_cast %53 : vector<2xf32> to vector<2x1xf32>
      %c0_42 = arith.constant 0 : index
      %c0_43 = arith.constant 0 : index
      %55 = vector.load %arg8[%c0_42, %c0_43] : memref<2x128xf32, #tpu.memory_space<vmem>>, vector<2x128xf32>
      %cst_44 = arith.constant dense<0.000000e+00> : vector<2xf32>
      %56 = vector.multi_reduction <add>, %55, %cst_44 [1] : vector<2x128xf32> to vector<2xf32>
      %57 = vector.shape_cast %56 : vector<2xf32> to vector<2x1xf32>
      %c0_45 = arith.constant 0 : index
      %c0_46 = arith.constant 0 : index
      %58 = vector.load %arg9[%c0_45, %c0_46] : memref<2x128xf32, #tpu.memory_space<vmem>>, vector<2x128xf32>
      %cst_47 = arith.constant dense<0.000000e+00> : vector<2xf32>
      %59 = vector.multi_reduction <add>, %58, %cst_47 [1] : vector<2x128xf32> to vector<2xf32>
      %60 = vector.shape_cast %59 : vector<2xf32> to vector<2x1xf32>
      %61 = arith.mulf %48, %51 : vector<2x1xf32>
      %cst_48 = arith.constant 3.906250e-03 : f32
      %62 = vector.broadcast %cst_48 : f32 to vector<2x1xf32>
      %63 = arith.mulf %61, %62 : vector<2x1xf32>
      %64 = arith.subf %60, %63 : vector<2x1xf32>
      %65 = arith.mulf %48, %48 : vector<2x1xf32>
      %cst_49 = arith.constant 3.906250e-03 : f32
      %66 = vector.broadcast %cst_49 : f32 to vector<2x1xf32>
      %67 = arith.mulf %65, %66 : vector<2x1xf32>
      %68 = arith.subf %54, %67 : vector<2x1xf32>
      %69 = arith.mulf %51, %51 : vector<2x1xf32>
      %cst_50 = arith.constant 3.906250e-03 : f32
      %70 = vector.broadcast %cst_50 : f32 to vector<2x1xf32>
      %71 = arith.mulf %69, %70 : vector<2x1xf32>
      %72 = arith.subf %57, %71 : vector<2x1xf32>
      %cst_51 = arith.constant 1.1920929E-7 : f32
      %73 = vector.broadcast %cst_51 : f32 to vector<2x1xf32>
      %74 = arith.addf %68, %73 : vector<2x1xf32>
      %75 = arith.divf %64, %74 : vector<2x1xf32>
      %76 = arith.mulf %75, %75 : vector<2x1xf32>
      %77 = arith.mulf %76, %68 : vector<2x1xf32>
      %cst_52 = arith.constant 2.000000e+00 : f32
      %78 = vector.broadcast %cst_52 : f32 to vector<2x1xf32>
      %79 = arith.mulf %78, %75 : vector<2x1xf32>
      %80 = arith.mulf %79, %64 : vector<2x1xf32>
      %81 = arith.subf %72, %80 : vector<2x1xf32>
      %82 = arith.addf %81, %77 : vector<2x1xf32>
      %cst_53 = arith.constant 1.1920929E-7 : f32
      %83 = vector.broadcast %cst_53 : f32 to vector<2x1xf32>
      %84 = arith.addf %82, %83 : vector<2x1xf32>
      %85 = arith.divf %77, %84 : vector<2x1xf32>
      %cst_54 = arith.constant 1.1920929E-7 : f32
      %86 = vector.broadcast %cst_54 : f32 to vector<2x1xf32>
      %87 = arith.addf %85, %86 : vector<2x1xf32>
      %88 = math.log %87 : vector<2x1xf32>
      %cst_55 = arith.constant 0.434294492 : f32
      %89 = vector.broadcast %cst_55 : f32 to vector<2x1xf32>
      %90 = arith.mulf %88, %89 : vector<2x1xf32>
      %cst_56 = arith.constant 1.000000e+01 : f32
      %91 = vector.broadcast %cst_56 : f32 to vector<2x1xf32>
      %92 = arith.mulf %91, %90 : vector<2x1xf32>
      %cst_57 = arith.constant 0.000000e+00 : f32
      %93 = vector.broadcast %cst_57 : f32 to vector<2x1xf32>
      %94 = arith.subf %93, %92 : vector<2x1xf32>
      %c0_58 = arith.constant 0 : index
      %c0_59 = arith.constant 0 : index
      %95 = vector.load %arg4[%c0_58, %c0_59] : memref<2x1xf32, #tpu.memory_space<vmem>>, vector<2x1xf32>
      tpu.vector_store %arg4[%c0_58, %c0_59], %94 {strides = array<i32>} : memref<2x1xf32, #tpu.memory_space<vmem>>, vector<2x1xf32>,
    } else {
    }
    return
  }
  func.func @transform_0(%arg0: i32, %arg1: i32) -> (i32, i32) {
    %c0_i32 = arith.constant 0 : i32
    return %arg0, %arg1 : i32, i32
  }
  func.func @transform_1(%arg0: i32, %arg1: i32) -> (i32, i32) {
    %c0_i32 = arith.constant 0 : i32
    return %arg0, %arg1 : i32, i32
  }
  func.func @transform_2(%arg0: i32, %arg1: i32) -> (i32, i32) {
    %c0_i32 = arith.constant 0 : i32
    %c0_i32_0 = arith.constant 0 : i32
    return %arg0, %c0_i32 : i32, i32
  }
}

</mosaic_0001>

<bundles_post_ra>
// kernel: tpu_custom_call.1
= control target key start
LH: loop header
LB: loop body
LE: loop exit
PB: predicated region body
PF: predicated region fallthrough
CT: control target
= control target key end

     0   :  { %7 = vsyncpa [#allocation8], 0  ;;  %s240_s0 = inlined_call_operand.hbm [shape: f32[2,256], index: 0, kind: input, shape index: {}]   ;;  %s241_s1 = inlined_call_operand.hbm [shape: f32[2,256], index: 1, kind: input, shape index: {}]   ;;  %s242_s2 = inlined_call_operand.vmem [shape: f32[2,1], index: 2, kind: output, shape index: {}]  }
   0x1   :  { %8 = vsyncpa [#allocation10], 0  ;;  %s195_s9 = smov [#allocation7]   ;;  %s196_s11 = smov [#allocation9]  }
   0x2   :  { %s15_s10 = sshll.u32 %s195_s9, 4  ;;  %s25_s12 = sshll.u32 %s196_s11, 4  ;;  %s16_s10 = int_to_ptr.vmem [resolvable:$true] %s15_s10  ;;  %s26_s12 = int_to_ptr.vmem [resolvable:$true] %s25_s12 }
   0x3   :  { %s147_s15 = scalar_lea.hbm %s240_s0, 64 }
   0x4   :  { %p148_p0 = scmp.ne.s32.totalorder %s240_s0, %s147_s15  ;;  %p151_p1 = scmp.lt.u32.totalorder %s147_s15, %s240_s0 }
   0x6   :  { %p153_p2 = pnand %p151_p1, %p148_p0 }
   0x8   :  { %156 = shalt.err (!%p153_p2)
}
   0x9   :  { %s157_s20 = scalar_lea.vmem %s16_s10, 64  ;;  %p162_p4 = scmp.lt.s32.totalorder %s16_s10, %s16_s10 }
   0xa   :  { %p158_p3 = scmp.ne.s32.totalorder %s16_s10, %s157_s20  ;;  %p163_p5 = scmp.lt.s32.totalorder %s157_s20, %s157_s20 }
   0xc   :  { %p164_p6 = por %p163_p5, %p162_p4 }
   0xe   :  { %p165_p7 = pnand %p164_p6, %p158_p3 }
  0x10   :  { %168 = shalt.err (!%p165_p7)
}
  0x11   :  { %18 = dma.hbm_to_vmem [thread:$0]  %s240_s0, 64, %s16_s10, [#allocation8]  }
  0x12   :  { %s169_s25 = scalar_lea.hbm %s241_s1, 64 }
  0x13   :  { %p170_p8 = scmp.ne.s32.totalorder %s241_s1, %s169_s25  ;;  %p173_p9 = scmp.lt.u32.totalorder %s169_s25, %s241_s1 }
  0x15   :  { %p175_p10 = pnand %p173_p9, %p170_p8 }
  0x17   :  { %178 = shalt.err (!%p175_p10)
}
  0x18   :  { %s179_s30 = scalar_lea.vmem %s26_s12, 64  ;;  %p184_p12 = scmp.lt.s32.totalorder %s26_s12, %s26_s12 }
  0x19   :  { %p180_p11 = scmp.ne.s32.totalorder %s26_s12, %s179_s30  ;;  %p185_p13 = scmp.lt.s32.totalorder %s179_s30, %s179_s30 }
  0x1b   :  { %p186_p0 = por %p185_p13, %p184_p12 }
  0x1d   :  { %p187_p1 = pnand %p186_p0, %p180_p11 }
  0x1f   :  { %190 = shalt.err (!%p187_p1)
}
  0x20   :  { %28 = dma.hbm_to_vmem [thread:$0]  %s241_s1, 64, %s26_s12, [#allocation10]  }
  0x21   :  { %191 = dma.done.wait [#allocation8], 64  }
  0x22   :  { %192 = vsyncadd [#allocation8], 4294967232 }
  0x23   :  { %193 = dma.done.wait [#allocation10], 64  }
  0x24   :  { %194 = vsyncadd [#allocation10], 4294967232  ;;  %v197_v0 = vmov 0.0   ;;  %v45_v1 = vld [vmem:[#allocation9] sm:$0x3]  ;;  %vm83_vm0 = vcmask 1041408  }
  0x25   :  { %40 = vst [vmem:[#allocation3] sm:$0x3] %v197_v0  ;;  %39 = vst [vmem:[#allocation2] sm:$0x3] %v197_v0  ;;  %v55_v2 = vld [vmem:[#allocation9 + $0x2] sm:$0x3]  ;;  %v50_v10 = vmul.f32 %v45_v1, %v45_v1 }
  0x26   :  { %41 = vst [vmem:[#allocation4] sm:$0x3] %v197_v0  ;;  %42 = vst [vmem:[#allocation5] sm:$0x3] %v197_v0  ;;  %v44_v3 = vld [vmem:[#allocation7] sm:$0x3]  ;;  %v57_v4 = vadd.f32 %v55_v2, %v45_v1  ;;  %v60_v14 = vmul.f32 %v55_v2, %v55_v2 }
  0x27   :  { %43 = vst [vmem:[#allocation6] sm:$0x3] %v197_v0  ;;  %v54_v6 = vld [vmem:[#allocation7 + $0x2] sm:$0x3]  ;;  %v52_v8 = vmul.f32 %v45_v1, %v44_v3  ;;  %v48_v9 = vmul.f32 %v44_v3, %v44_v3  ;;  %vm130_vm1 = vcmask 1024  }
  0x28   :  { %v56_v11 = vadd.f32 %v54_v6, %v44_v3  ;;  %v62_v12 = vmul.f32 %v55_v2, %v54_v6  ;;  %v58_v13 = vmul.f32 %v54_v6, %v54_v6  ;;  %v61_v22 = vadd.f32 %v60_v14, %v50_v10 }
  0x2a   :  { %v63_v20 = vadd.f32 %v62_v12, %v52_v8  ;;  %v59_v21 = vadd.f32 %v58_v13, %v48_v9 }
  0x2c   :  { %v67_v5 = vld [vmem:[#allocation3] sm:$0x3]  ;;  %v64_v7 = vld [vmem:[#allocation2] sm:$0x3] }
  0x2d   :  { %v68_v15 = vadd.f32 %v67_v5, %v57_v4  ;;  %v70_v17 = vld [vmem:[#allocation4] sm:$0x3]  ;;  %v73_v18 = vld [vmem:[#allocation5] sm:$0x3]  ;;  %v65_v19 = vadd.f32 %v64_v7, %v56_v11 }
  0x2e   :  { %v76_v16 = vld [vmem:[#allocation6] sm:$0x3]  ;;  %v71_v24 = vadd.f32 %v70_v17, %v59_v21  ;;  %v74_v25 = vadd.f32 %v73_v18, %v61_v22 }
  0x2f   :  { %69 = vst [vmem:[#allocation3] sm:$0x3] %v68_v15  ;;  %66 = vst [vmem:[#allocation2] sm:$0x3] %v65_v19  ;;  %v77_v23 = vadd.f32 %v76_v16, %v63_v20 }
  0x30   :  { %72 = vst [vmem:[#allocation4] sm:$0x3] %v71_v24  ;;  %75 = vst [vmem:[#allocation5] sm:$0x3] %v74_v25 }
  0x31   :  { %78 = vst [vmem:[#allocation6] sm:$0x3] %v77_v23 }
  0x36   :  { %v87_v26 = vld [vmem:[#allocation3] sm:$0x3]  ;;  %v82_v28 = vld [vmem:[#allocation2] sm:$0x3] }
  0x37   :  { %v88_v27 = vsel %vm83_vm0, %v87_v26, 0.0  ;;  %v84_v29 = vsel %vm83_vm0, %v82_v28, 0.0  ;;  %v91_v31 = vld [vmem:[#allocation4] sm:$0x3]  ;;  %v95_v34 = vld [vmem:[#allocation5] sm:$0x3] }
  0x38   :  { %89 = vadd.xlane.f32.xlu1 %v88_v27  ;;  %85 = vadd.xlane.f32.xlu0 %v84_v29  ;;  %v99_v30 = vld [vmem:[#allocation6] sm:$0x3]  ;;  %v92_v33 = vsel %vm83_vm0, %v91_v31, 0.0  ;;  %v96_v35 = vsel %vm83_vm0, %v95_v34, 0.0 }
  0x39   :  { %v100_v32 = vsel %vm83_vm0, %v99_v30, 0.0 }
  0x3c   :  { %101 = vadd.xlane.f32.xlu1 %v100_v32  ;;  %93 = vadd.xlane.f32.xlu0 %v92_v33 }
  0x40   :  { %97 = vadd.xlane.f32.xlu0 %v96_v35 }
  0xc5   :  { %v86_v36 = vpop.xlane.xlu0 %85  ;;  %v90_v41 = vpop.xlane.xlu1 %89 }
  0xc6   :  { %v106_v37 = vmul.f32 %v86_v36, %v86_v36  ;;  %v103_v43 = vmul.f32 %v90_v41, %v86_v36  ;;  %v109_v46 = vmul.f32 %v90_v41, %v90_v41 }
  0xc8   :  { %v107_v38 = vmul.f32 0.00390625, %v106_v37  ;;  %v104_v44 = vmul.f32 0.00390625, %v103_v43  ;;  %v110_v49 = vmul.f32 0.00390625, %v109_v46 }
  0xc9   :  { %v94_v39 = vpop.xlane.xlu0 %93  ;;  %v102_v45 = vpop.xlane.xlu1 %101 }
  0xca   :  { %v108_v40 = vsub.f32 %v94_v39, %v107_v38  ;;  %v105_v47 = vsub.f32 %v102_v45, %v104_v44 }
  0xcc   :  { %v112_v42 = vadd.f32 1.1920929e-07, %v108_v40 }
  0xcd   :  { %v98_v51 = vpop.xlane.xlu0 %97 }
  0xce   :  { %141 = vrcp.f32 %v112_v42  ;;  %v111_v55 = vsub.f32 %v98_v51, %v110_v49 }
  0xd8   :  { %v142_v48 = vpop.eup %141 }
  0xd9   :  { %v114_v50 = vmul.f32 %v142_v48, %v105_v47 }
  0xdb   :  { %v115_v52 = vmul.f32 %v114_v50, %v114_v50  ;;  %v117_v53 = vmul.f32 2.0, %v114_v50 }
  0xdd   :  { %v118_v54 = vmul.f32 %v117_v53, %v105_v47  ;;  %v116_v56 = vmul.f32 %v115_v52, %v108_v40 }
  0xdf   :  { %v119_v57 = vsub.f32 %v111_v55, %v118_v54 }
  0xe1   :  { %v120_v58 = vadd.f32 %v119_v57, %v116_v56 }
  0xe3   :  { %v121_v59 = vadd.f32 1.1920929e-07, %v120_v58 }
  0xe5   :  { %143 = vrcp.f32 %v121_v59 }
  0xef   :  { %v144_v60 = vpop.eup %143 }
  0xf0   :  { %v123_v61 = vmul.f32 %v144_v60, %v116_v56 }
  0xf2   :  { %v124_v62 = vadd.f32 1.1920929e-07, %v123_v61 }
  0xf4   :  { %145 = vlog2.f32 %v124_v62 }
  0xfe   :  { %v146_v63 = vpop.eup %145 }
  0xff   :  { %v126_v0 = vmul.f32 0.6931472, %v146_v63 }
 0x101   :  { %v127_v1 = vmul.f32 0.4342945, %v126_v0 }
 0x103   :  { %v128_v2 = vmul.f32 10.0, %v127_v1 }
 0x105   :  { %v129_v3 = vsub.f32 0.0, %v128_v2 }
 0x107   :  { %131 = vst.msk [vmem:[%s242_s2] sm:$0x3] %vm130_vm1, %v129_v3 }
 0x108   :  { %136 = vsyncpa [#allocation8], 1 }
 0x109   :  { %137 = vsyncpa [#allocation10], 1 }

</bundles_post_ra>
